<compile_context>
chip_gen: v6e
topology: v6e:2x2x1
jax: 0.10.0
libtpu: 0.0.40
codegen_flags: <defaults>
</compile_context>

<pallas_src>
import functools

import jax
import jax.numpy as jnp
import numpy as np
from jax.experimental import pallas as pl
from jax.experimental.pallas import tpu as pltpu

_LANES = 128
_SUBLANES = 8
_GRAN = _LANES * _SUBLANES          # minimal pad granularity (1024 elements)
_NUM_BLOCKS = 2                     # leading 'parallel' axis (v7x has 2 TCs)
_MAX_BLOCK_ROWS = 2048              # (2048,128) f32 tile = 1 MiB
_VMEM_LIMIT = 32 * 1024 * 1024


def _cdiv(a, b):
    return -(-a // b)


def _round_up(x, m):
    return _cdiv(x, m) * m


def _pow_static(d, gamma):
    """d ** gamma for static gamma, cheap for (half-)integer gammas."""
    g = float(gamma)
    if g == 0.0:
        return jnp.ones_like(d)
    two_g = 2.0 * g
    if g > 0.0 and two_g == int(two_g):
        k = int(two_g)                      # gamma = k / 2
        out = None
        for _ in range(k // 2):
            out = d if out is None else out * d
        if k % 2:
            s = jnp.sqrt(d)                 # exact at d == 0, single EUP op
            out = s if out is None else out * s
        return out
    # General fallback (guard d == 0).
    return jnp.exp(g * jnp.log(jnp.maximum(d, 1e-30)))


def _focal_terms(x, t, *, alpha, gamma):
    """Elementwise quality focal loss (f32 throughout), EUP-lean."""
    e = jnp.exp(-jnp.abs(x))                                   # EUP: exp
    # Numerically-stable BCE with logits (reduction='none').
    bce = jnp.maximum(x, 0.0) - x * t + jnp.log1p(e)           # EUP: log1p
    # sigmoid(x) reusing e: 1/(1+e) for x>=0, e/(1+e) for x<0.
    r = 1.0 / (1.0 + e)                                        # EUP: recip
    p = jnp.where(x >= 0.0, r, e * r)
    alpha_factor = t * alpha + (1.0 - t) * (1.0 - alpha)
    d = jnp.abs(t - p)
    return bce * alpha_factor * _pow_static(d, gamma)          # EUP: sqrt


def _qfocal_sum_kernel(pred_ref, true_ref, out_ref, *, alpha, gamma, n_valid,
                       tiles_per_block, first_masked_tile, need_mask):
    """Per-block resident (8,128) accumulator; row 0 holds the lane partials."""
    c = pl.program_id(0)                 # 'parallel' block axis
    i = pl.program_id(1)                 # 'arbitrary' reduction axis
    g = c * tiles_per_block + i          # global tile index (may overrun)

    @pl.when(i == 0)
    def _():
        out_ref[...] = jnp.zeros_like(out_ref)

    x = pred_ref[...].astype(jnp.float32)
    t = true_ref[...].astype(jnp.float32)
    loss = _focal_terms(x, t, alpha=alpha, gamma=gamma)

    if need_mask:
        @pl.when(g < first_masked_tile)
        def _():
            out_ref[0:1, :] = out_ref[0:1, :] + jnp.sum(loss, axis=0,
                                                        keepdims=True)

        @pl.when(g >= first_masked_tile)
        def _():
            tr, lanes = loss.shape
            row = jax.lax.broadcasted_iota(jnp.int32, (tr, lanes), 0)
            lane = jax.lax.broadcasted_iota(jnp.int32, (tr, lanes), 1)
            gidx = (g * tr + row) * lanes + lane
            masked = jnp.where(gidx < n_valid, loss, 0.0)
            out_ref[0:1, :] = out_ref[0:1, :] + jnp.sum(masked, axis=0,
                                                        keepdims=True)
    else:
        out_ref[0:1, :] = out_ref[0:1, :] + jnp.sum(loss, axis=0,
                                                    keepdims=True)


def _qfocal_elem_kernel(pred_ref, true_ref, out_ref, *, alpha, gamma):
    """reduction='none' path: lane-dense elementwise loss."""
    x = pred_ref[...].astype(jnp.float32)
    t = true_ref[...].astype(jnp.float32)
    out_ref[...] = _focal_terms(x, t, alpha=alpha,
                                gamma=gamma).astype(out_ref.dtype)


def qfocal_loss(pred, true, *, gamma=1.5, alpha=0.25, reduction="mean",
                max_block_rows=_MAX_BLOCK_ROWS):
    """QFocalLoss(BCEWithLogitsLoss(reduction=reduction)).forward(pred, true)."""
    assert pred.shape == true.shape
    orig_shape = pred.shape
    n = int(np.prod(orig_shape))

    # Lane-dense (m_rows, 128) slab. Pad only to 8x128 granularity (<= 1023
    # extra elements) and only when actually needed; no host-side dtype cast.
    n_pad = _round_up(n, _GRAN)
    pad = n_pad - n
    m_rows = n_pad // _LANES

    p_flat = pred.reshape(-1)
    t_flat = true.reshape(-1)
    if pad:
        p_flat = jnp.pad(p_flat, (0, pad))
        t_flat = jnp.pad(t_flat, (0, pad))
    p2 = p_flat.reshape(m_rows, _LANES)
    t2 = t_flat.reshape(m_rows, _LANES)

    tr = min(max_block_rows, m_rows)      # multiple of 8 (m_rows is)
    n_tiles = _cdiv(m_rows, tr)           # last tile may be partial
    # gidx math is int32; guard against overflow (not a realistic YOLO size).
    assert n_tiles * tr * _LANES < 2**31 - 1

    if reduction in ("mean", "sum"):
        tpb = _cdiv(n_tiles, _NUM_BLOCKS)
        covered = n_tiles * tr * _LANES
        has_tail = covered > n
        has_dup = _NUM_BLOCKS * tpb > n_tiles
        need_mask = has_tail or has_dup
        first_masked_tile = (n_tiles - 1) if has_tail else n_tiles

        def in_map(c, i):
            # Clamp overrun tiles onto the last valid tile; their contribution
            # is fully masked out in-kernel (gidx >= n).
            return (jnp.minimum(c * tpb + i, n_tiles - 1), 0)

        kern = functools.partial(
            _qfocal_sum_kernel, alpha=float(alpha), gamma=float(gamma),
            n_valid=n, tiles_per_block=tpb,
            first_masked_tile=first_masked_tile, need_mask=need_mask)

        partials = pl.pallas_call(
            kern,
            out_shape=jax.ShapeDtypeStruct((_NUM_BLOCKS * _SUBLANES, _LANES),
                                           jnp.float32),
            grid=(_NUM_BLOCKS, tpb),
            in_specs=[pl.BlockSpec((tr, _LANES), in_map),
                      pl.BlockSpec((tr, _LANES), in_map)],
            out_specs=pl.BlockSpec((_SUBLANES, _LANES), lambda c, i: (c, 0)),
            compiler_params=pltpu.CompilerParams(
                dimension_semantics=("parallel", "arbitrary"),
                vmem_limit_bytes=_VMEM_LIMIT),
        )(p2, t2)
        total = jnp.sum(partials)          # tiny (16,128) final reduce
        return total / n if reduction == "mean" else total

    # reduction == 'none'
    loss2 = pl.pallas_call(
        functools.partial(_qfocal_elem_kernel, alpha=float(alpha),
                          gamma=float(gamma)),
        out_shape=jax.ShapeDtypeStruct((m_rows, _LANES), pred.dtype),
        grid=(n_tiles,),
        in_specs=[pl.BlockSpec((tr, _LANES), lambda i: (i, 0)),
                  pl.BlockSpec((tr, _LANES), lambda i: (i, 0))],
        out_specs=pl.BlockSpec((tr, _LANES), lambda i: (i, 0)),
        compiler_params=pltpu.CompilerParams(
            dimension_semantics=("parallel",),
            vmem_limit_bytes=_VMEM_LIMIT),
    )(p2, t2)
    if pad == 0:
        return loss2.reshape(orig_shape)
    return loss2.reshape(-1)[:n].reshape(orig_shape)


def qfocal_loss_reference(pred, true, *, gamma=1.5, alpha=0.25,
                          reduction="mean"):
    """Pure-JAX reference matching the PyTorch QFocalLoss(BCEWithLogitsLoss)."""
    x = pred.astype(jnp.float32)
    t = true.astype(jnp.float32)
    bce = jnp.logaddexp(0.0, x) - x * t
    p = jax.nn.sigmoid(x)
    loss = bce * (t * alpha + (1.0 - t) * (1.0 - alpha)) * jnp.abs(t - p) ** gamma
    if reduction == "mean":
        return loss.mean()
    if reduction == "sum":
        return loss.sum()
    return loss


if __name__ == "__main__":
    key = jax.random.PRNGKey(0)

    # YOLO-style prediction tensors: (bs, na, ny, nx, no) logits + soft targets
    # in [0,1]. Second shape exercises the non-multiple-of-1024 pad/mask path.
    shapes = [(2, 3, 16, 16, 8), (2, 3, 7, 5, 9)]

    for si, shape in enumerate(shapes):
        k1, k2 = jax.random.split(jax.random.fold_in(key, si))
        pred = 2.0 * jax.random.normal(k1, shape, jnp.float32)
        true = jax.random.uniform(k2, shape, jnp.float32)

        for reduction in ("mean", "sum", "none"):
            out = jax.block_until_ready(
                qfocal_loss(pred, true, reduction=reduction))
            ref = qfocal_loss_reference(pred, true, reduction=reduction)
            np.testing.assert_allclose(np.asarray(out), np.asarray(ref),
                                       rtol=1e-4, atol=1e-5)

    print("KERNEL_OK")
</pallas_src>

<mosaic_0001>
module attributes {stable_mosaic.version = 11 : i64} {
  func.func @_qfocal_sum_kernel(%arg0: i32, %arg1: i32, %arg2: memref<96x128xf32, #tpu.memory_space<vmem>>, %arg3: memref<96x128xf32, #tpu.memory_space<vmem>>, %arg4: memref<8x128xf32, #tpu.memory_space<vmem>>) attributes {dimension_semantics = [#tpu.dimension_semantics<parallel>, #tpu.dimension_semantics<arbitrary>], iteration_bounds = array<i64: 2, 1>, scalar_prefetch = 0 : i64, scratch_operands = 0 : i64, tpu.core_type = #tpu.core_type<tc>, window_params = [{transform_indices = @transform_0, window_bounds = array<i64: 96, 128>}, {transform_indices = @transform_1, window_bounds = array<i64: 96, 128>}, {transform_indices = @transform_2, window_bounds = array<i64: 8, 128>}]} {
    %c1_i32 = arith.constant 1 : i32
    %0 = arith.muli %arg0, %c1_i32 : i32
    %1 = arith.addi %0, %arg1 : i32
    %c0_i32 = arith.constant 0 : i32
    %2 = arith.cmpi eq, %arg1, %c0_i32 : i32
    %3 = arith.extui %2 : i1 to i32
    %c0_i32_0 = arith.constant 0 : i32
    %4 = arith.cmpi ne, %3, %c0_i32_0 : i32
    scf.if %4 {
      %cst_15 = arith.constant 0.000000e+00 : f32
      %44 = vector.broadcast %cst_15 : f32 to vector<8x128xf32>
      %c0_16 = arith.constant 0 : index
      %c0_17 = arith.constant 0 : index
      %45 = vector.load %arg4[%c0_16, %c0_17] : memref<8x128xf32, #tpu.memory_space<vmem>>, vector<8x128xf32>
      tpu.vector_store %arg4[%c0_16, %c0_17], %44 {strides = array<i32>} : memref<8x128xf32, #tpu.memory_space<vmem>>, vector<8x128xf32>,
    } else {
    }
    %c0 = arith.constant 0 : index
    %c0_1 = arith.constant 0 : index
    %5 = vector.load %arg2[%c0, %c0_1] : memref<96x128xf32, #tpu.memory_space<vmem>>, vector<96x128xf32>
    %c0_2 = arith.constant 0 : index
    %c0_3 = arith.constant 0 : index
    %6 = vector.load %arg3[%c0_2, %c0_3] : memref<96x128xf32, #tpu.memory_space<vmem>>, vector<96x128xf32>
    %7 = math.absf %5 : vector<96x128xf32>
    %cst = arith.constant 0.000000e+00 : f32
    %8 = vector.broadcast %cst : f32 to vector<96x128xf32>
    %9 = arith.subf %8, %7 : vector<96x128xf32>
    %10 = math.exp %9 : vector<96x128xf32>
    %cst_4 = arith.constant 0.000000e+00 : f32
    %11 = vector.broadcast %cst_4 : f32 to vector<96x128xf32>
    %12 = arith.maximumf %5, %11 : vector<96x128xf32>
    %13 = arith.mulf %5, %6 : vector<96x128xf32>
    %14 = arith.subf %12, %13 : vector<96x128xf32>
    %15 = math.log1p %10 : vector<96x128xf32>
    %16 = arith.addf %14, %15 : vector<96x128xf32>
    %cst_5 = arith.constant 1.000000e+00 : f32
    %17 = vector.broadcast %cst_5 : f32 to vector<96x128xf32>
    %18 = arith.addf %17, %10 : vector<96x128xf32>
    %cst_6 = arith.constant 1.000000e+00 : f32
    %19 = vector.broadcast %cst_6 : f32 to vector<96x128xf32>
    %20 = arith.divf %19, %18 : vector<96x128xf32>
    %cst_7 = arith.constant 0.000000e+00 : f32
    %21 = vector.broadcast %cst_7 : f32 to vector<96x128xf32>
    %22 = arith.cmpf oge, %5, %21 : vector<96x128xf32>
    %23 = arith.mulf %10, %20 : vector<96x128xf32>
    %24 = arith.select %22, %20, %23 : vector<96x128xi1>, vector<96x128xf32>
    %cst_8 = arith.constant 2.500000e-01 : f32
    %25 = vector.broadcast %cst_8 : f32 to vector<96x128xf32>
    %26 = arith.mulf %6, %25 : vector<96x128xf32>
    %cst_9 = arith.constant 1.000000e+00 : f32
    %27 = vector.broadcast %cst_9 : f32 to vector<96x128xf32>
    %28 = arith.subf %27, %6 : vector<96x128xf32>
    %cst_10 = arith.constant 7.500000e-01 : f32
    %29 = vector.broadcast %cst_10 : f32 to vector<96x128xf32>
    %30 = arith.mulf %28, %29 : vector<96x128xf32>
    %31 = arith.addf %26, %30 : vector<96x128xf32>
    %32 = arith.subf %6, %24 : vector<96x128xf32>
    %33 = math.absf %32 : vector<96x128xf32>
    %34 = arith.mulf %16, %31 : vector<96x128xf32>
    %35 = math.sqrt %33 : vector<96x128xf32>
    %36 = arith.mulf %33, %35 : vector<96x128xf32>
    %37 = arith.mulf %34, %36 : vector<96x128xf32>
    %c1_i32_11 = arith.constant 1 : i32
    %38 = arith.cmpi slt, %1, %c1_i32_11 : i32
    %39 = arith.extui %38 : i1 to i32
    %c0_i32_12 = arith.constant 0 : i32
    %40 = arith.cmpi ne, %39, %c0_i32_12 : i32
    scf.if %40 {
      %c0_15 = arith.constant 0 : index
      %c0_16 = arith.constant 0 : index
      %44 = vector.load %arg4[%c0_15, %c0_16] : memref<8x128xf32, #tpu.memory_space<vmem>>, vector<1x128xf32>
      %cst_17 = arith.constant dense<0.000000e+00> : vector<128xf32>
      %45 = vector.multi_reduction <add>, %37, %cst_17 [0] : vector<96x128xf32> to vector<128xf32>
      %46 = vector.shape_cast %45 : vector<128xf32> to vector<1x128xf32>
      %47 = arith.addf %44, %46 : vector<1x128xf32>
      %c0_18 = arith.constant 0 : index
      %c0_19 = arith.constant 0 : index
      %48 = vector.load %arg4[%c0_18, %c0_19] : memref<8x128xf32, #tpu.memory_space<vmem>>, vector<1x128xf32>
      tpu.vector_store %arg4[%c0_18, %c0_19], %47 {strides = array<i32>} : memref<8x128xf32, #tpu.memory_space<vmem>>, vector<1x128xf32>,
    } else {
    }
    %c1_i32_13 = arith.constant 1 : i32
    %41 = arith.cmpi sge, %1, %c1_i32_13 : i32
    %42 = arith.extui %41 : i1 to i32
    %c0_i32_14 = arith.constant 0 : i32
    %43 = arith.cmpi ne, %42, %c0_i32_14 : i32
    scf.if %43 {
      %44 = tpu.iota {dimensions = array<i32: 0>} : vector<96x128xi32>
      %45 = tpu.iota {dimensions = array<i32: 1>} : vector<96x128xi32>
      %c96_i32 = arith.constant 96 : i32
      %46 = arith.muli %1, %c96_i32 : i32
      %47 = vector.broadcast %46 : i32 to vector<96x128xi32>
      %48 = arith.addi %47, %44 : vector<96x128xi32>
      %c128_i32 = arith.constant 128 : i32
      %49 = vector.broadcast %c128_i32 : i32 to vector<96x128xi32>
      %50 = arith.muli %48, %49 : vector<96x128xi32>
      %51 = arith.addi %50, %45 : vector<96x128xi32>
      %c12288_i32 = arith.constant 12288 : i32
      %52 = vector.broadcast %c12288_i32 : i32 to vector<96x128xi32>
      %53 = arith.cmpi slt, %51, %52 : vector<96x128xi32>
      %cst_15 = arith.constant 0.000000e+00 : f32
      %54 = vector.broadcast %cst_15 : f32 to vector<96x128xf32>
      %55 = arith.select %53, %37, %54 : vector<96x128xi1>, vector<96x128xf32>
      %c0_16 = arith.constant 0 : index
      %c0_17 = arith.constant 0 : index
      %56 = vector.load %arg4[%c0_16, %c0_17] : memref<8x128xf32, #tpu.memory_space<vmem>>, vector<1x128xf32>
      %cst_18 = arith.constant dense<0.000000e+00> : vector<128xf32>
      %57 = vector.multi_reduction <add>, %55, %cst_18 [0] : vector<96x128xf32> to vector<128xf32>
      %58 = vector.shape_cast %57 : vector<128xf32> to vector<1x128xf32>
      %59 = arith.addf %56, %58 : vector<1x128xf32>
      %c0_19 = arith.constant 0 : index
      %c0_20 = arith.constant 0 : index
      %60 = vector.load %arg4[%c0_19, %c0_20] : memref<8x128xf32, #tpu.memory_space<vmem>>, vector<1x128xf32>
      tpu.vector_store %arg4[%c0_19, %c0_20], %59 {strides = array<i32>} : memref<8x128xf32, #tpu.memory_space<vmem>>, vector<1x128xf32>,
    } else {
    }
    return
  }
  func.func @transform_0(%arg0: i32, %arg1: i32) -> (i32, i32) {
    %c1_i32 = arith.constant 1 : i32
    %0 = arith.muli %arg0, %c1_i32 : i32
    %1 = arith.addi %0, %arg1 : i32
    %c0_i32 = arith.constant 0 : i32
    %2 = arith.minsi %1, %c0_i32 : i32
    %c0_i32_0 = arith.constant 0 : i32
    %c0_i32_1 = arith.constant 0 : i32
    return %2, %c0_i32_0 : i32, i32
  }
  func.func @transform_1(%arg0: i32, %arg1: i32) -> (i32, i32) {
    %c1_i32 = arith.constant 1 : i32
    %0 = arith.muli %arg0, %c1_i32 : i32
    %1 = arith.addi %0, %arg1 : i32
    %c0_i32 = arith.constant 0 : i32
    %2 = arith.minsi %1, %c0_i32 : i32
    %c0_i32_0 = arith.constant 0 : i32
    %c0_i32_1 = arith.constant 0 : i32
    return %2, %c0_i32_0 : i32, i32
  }
  func.func @transform_2(%arg0: i32, %arg1: i32) -> (i32, i32) {
    %c0_i32 = arith.constant 0 : i32
    %c0_i32_0 = arith.constant 0 : i32
    return %arg0, %c0_i32 : i32, i32
  }
}

</mosaic_0001>

<bundles_post_ra>
// kernel: tpu_custom_call.1
= control target key start
LH: loop header
LB: loop body
LE: loop exit
PB: predicated region body
PF: predicated region fallthrough
CT: control target
= control target key end

     0   :  { %7 = vsyncpa [#allocation3], 0  ;;  %s2333_s0 = inlined_call_operand.hbm [shape: f32[96,128], index: 0, kind: input, shape index: {}]   ;;  %s2334_s1 = inlined_call_operand.hbm [shape: f32[96,128], index: 1, kind: input, shape index: {}]   ;;  %s2335_s2 = inlined_call_operand.hbm [shape: f32[16,128], index: 2, kind: output, shape index: {}]  }
   0x1   :  { %9 = vsyncpa [#allocation3 + $0x1], 0 }
   0x2   :  { %10 = vsyncpa [#allocation6], 0 }
   0x3   :  { %12 = vsyncpa [#allocation6 + $0x1], 0 }
   0x4   :  { %13 = vsyncpa [#allocation4], 0 }
   0x5   :  { %15 = vsyncpa [#allocation4 + $0x1], 0  ;;  %s1371_s9 = smov 0   ;;  %s1373_s10 = smov 0  }
   0x6   :  { %s1375_s11 = smov 0   ;;  %s1377_s12 = smov 0  }
   0x7   :  { %s1379_s13 = smov 0   ;;  %s1381_s14 = smov 0  }
   0x8   :  { %s1383_s15 = smov 0   ;;  %s1385_s16 = smov 0  }
   0x9 LB: > { %s978_s17 = sadd.s32 4294967295, %s1348_s16   ;;  %s979_s18 = sadd.s32 4294967294, %s1348_s16   ;;  %s1348_s16 = sphi %s1385_s16, %s21_s16   ;;  %s1344_s15 = sphi %s1383_s15, %s2553_s15   ;;  %s1340_s14 = sphi %s1381_s14, %s2552_s14   ;;  %s1336_s13 = sphi %s1379_s13, %s2323_s13   ;;  %s1332_s12 = sphi %s1377_s12, %s2551_s12   ;;  %s1328_s11 = sphi %s1375_s11, %s2550_s11   ;;  %s1324_s10 = sphi %s1373_s10, %s2549_s10   ;;  %s1320_s9 = sphi %s1371_s9, %s2548_s9  }
   0xa   : > { %s33_s19 = sadd.s32 1, %s1344_s15  ;;  %p1317_p1 = scmp.ne.s32.totalorder %s1336_s13, 0 }
   0xb   : > { %p35_p0 = scmp.ge.s32.totalorder %s33_s19, 2  ;;  %p54_p2 = scmp.eq.s32.totalorder %s1348_s16, 0 }
   0xc   : > { %p59_p3 = scmp.ne.s32.totalorder %s1336_s13, %s1332_s12  ;;  %p60_p5 = scmp.eq.s32.totalorder %s978_s17, 0 }
   0xd   : > { %s2555_s19 = smov (%p35_p0, %s33_s19), 0  ;;  %p1417_p4 = por %p1317_p1, %p54_p2 }
   0xe   : > { %p1421_p6 = por %p60_p5, %p59_p3  ;;  %s101_s22 = ssub.s32 %s1344_s15, %s2555_s19 }
   0xf   : > { %p102_p7 = scmp.eq.s32.totalorder %s101_s22, 0  ;;  %s104_s23 = sadd.s32 1, %s1328_s11 }
  0x10   : > { %s2396_s21 = scalar_select %p1421_p6, 1, 0 }
  0x11   : > { %s1429_s24 = scalar_select %p102_p7, %s1328_s11, %s104_s23  }
  0x12   : > { %p114_p8 = scmp.ne.s32.totalorder %s1328_s11, %s1324_s10  ;;  %p115_p9 = scmp.eq.s32.totalorder %s978_s17, 1 }
  0x13   : > { %p120_p10 = scmp.ne.s32.totalorder %s1324_s10, %s1320_s9  ;;  %p121_p11 = scmp.eq.s32.totalorder %s979_s18, 1 }
  0x14   : > { %p1435_p12 = por %p115_p9, %p114_p8  ;;  %p1014_p1 = scmp.lt.s32.totalorder %s1348_s16, 2 }
  0x15   : > { %p1440_p0 = por %p121_p11, %p120_p10  ;;  %s1350_s28 = smov [#allocation2]  }
  0x16   : > { %s2397_s25 = scalar_select %p1435_p12, 1, 0 }
  0x17   : > { %s2398_s26 = scalar_select %p1440_p0, 1, 0 }
  0x18   : > { %p1447_p2 = pnand %p1014_p1, %p1417_p4  ;;  %s155_s29 = sshll.u32 %s1350_s28, 4  ;;  %s156_s29 = int_to_ptr.vmem [resolvable:$true] %s155_s29 }
  0x19   : > { %s1187_s4 = scalar_lea.hbm %s2333_s0, 1536 }
  0x1a   : > { %p1188_p3 = scmp.ne.s32.totalorder %s2333_s0, %s1187_s4  ;;  %p1189_p5 = pneg %p1447_p2 }
  0x1b   : > { %p1194_p8 = scmp.lt.s32.totalorder %s1187_s4, %s1187_s4 }
  0x1c   : > { %p1190_p4 = pnand %p1189_p5, %p1188_p3 }
  0x1e   : > { %p1191_p7 = pneg %p1190_p4 }
  0x20   : > { %p1196_p9 = pnand %p1194_p8, %p1191_p7 }
  0x22   : > { %1199 = shalt.err (!%p1196_p9)
}
  0x23   : > { %s1200_s7 = scalar_lea.vmem %s156_s29, 1536  ;;  %s1207_s8 = scalar_lea.vmem %s156_s29, 3072 }
  0x24   : > { %p1201_p10 = scmp.ne.s32.totalorder %s156_s29, %s1200_s7  ;;  %p1208_p13 = scmp.lt.s32.totalorder %s156_s29, %s156_s29 }
  0x25   : > { %p1209_p0 = scmp.lt.s32.totalorder %s1207_s8, %s1200_s7 }
  0x26   : > { %p1203_p11 = pnand %p1201_p10, %p1189_p5 }
  0x27   : > { %p1210_p12 = por %p1209_p0, %p1208_p13 }
  0x28   : > { %p1204_p1 = pneg %p1203_p11 }
  0x2a   : > { %p1211_p6 = pnand %p1210_p12, %p1204_p1 }
  0x2c   : > { %1214 = shalt.err (!%p1211_p6)
}
  0x2d   : > { %s1351_s12 = smov 128   ;;  %s1352_s17 = smov 8  }
  0x2e   : > { %1006 = dma.hbm_to_vmem [thread:$0]  (!%p1447_p2), %s2333_s0, 1536, %s156_s29, [#allocation3], %s1351_s12, %s1351_s12, %s1352_s17  }
  0x2f   : > { %p984_p3 = scmp.ge.s32.totalorder %s1348_s16, 1  ;;  %p187_p4 = scmp.lt.s32.totalorder %s1348_s16, 3 }
  0x30   : > { %s1353_s23 = smov [#allocation5]   ;;  %s1215_s4 = scalar_lea.hbm %s2334_s1, 1536 }
  0x31   : > { %p1472_p7 = pnand %p984_p3, %p187_p4  ;;  %s179_s28 = sshll.u32 %s1353_s23, 4  ;;  %s180_s28 = int_to_ptr.vmem [resolvable:$true] %s179_s28 }
  0x32   : > { %p1216_p6 = scmp.ne.s32.totalorder %s2334_s1, %s1215_s4  ;;  %p1222_p0 = scmp.lt.s32.totalorder %s1215_s4, %s1215_s4 }
  0x33   : > { %s2400_s22 = scalar_select %p1472_p7, 1, 0 }
  0x34   : > { %p1218_p12 = pnand %p1216_p6, %p1189_p5 }
  0x36   : > { %p1219_p13 = pneg %p1218_p12 }
  0x38   : > { %p1224_p8 = pnand %p1222_p0, %p1219_p13 }
  0x3a   : > { %1227 = shalt.err (!%p1224_p8)
}
  0x3b   : > { %s1228_s29 = scalar_lea.vmem %s180_s28, 1536  ;;  %s1235_s7 = scalar_lea.vmem %s180_s28, 3072 }
  0x3c   : > { %p1229_p9 = scmp.ne.s32.totalorder %s180_s28, %s1228_s29  ;;  %p1236_p1 = scmp.lt.s32.totalorder %s180_s28, %s180_s28 }
  0x3d   : > { %p1237_p3 = scmp.lt.s32.totalorder %s1235_s7, %s1228_s29 }
  0x3e   : > { %p1231_p10 = pnand %p1229_p9, %p1189_p5 }
  0x3f   : > { %p1238_p4 = por %p1237_p3, %p1236_p1 }
  0x40   : > { %p1232_p11 = pneg %p1231_p10 }
  0x42   : > { %p1239_p7 = pnand %p1238_p4, %p1232_p11 }
  0x44   : > { %1242 = shalt.err (!%p1239_p7)
}
  0x45   : > { %1009 = dma.hbm_to_vmem [thread:$0]  (!%p1447_p2), %s2334_s1, 1536, %s180_s28, [#allocation6], %s1351_s12, %s1351_s12, %s1352_s17  }
  0x46   : > { %p2401_p6 = scmp.ne.s32.totalorder %s2400_s22, 0 }
  0x48   : > { %191 = sbr.rel (%p2401_p6) target bundleno = 321 (0x141), region = 28 }
  0x4d   : > { %s193_s20 = sand.u32 1, %s1336_s13   ;;  %p2402_p5 = scmp.ne.s32.totalorder %s2396_s21, 0 }
  0x4e   : > { %s996_s23 = smul.u32 96, %s193_s20  ;;  %s194_s30 = scalar_lea.sflag [#allocation3], %s193_s20 }
  0x50   : > { %s1496_s3 = scalar_lea.vmem [#allocation2], %s996_s23 }
  0x51   : > { %1306 = dma.done.wait (%p2402_p5), %s194_s30, 1536  }
  0x52   : > { %1308 = vsyncadd (%p2402_p5), %s194_s30, 4294965760  ;;  %s203_s27 = scalar_lea.sflag [#allocation6], %s193_s20  ;;  %s1502_s4 = scalar_lea.vmem [#allocation5], %s996_s23 }
  0x53   : > { %1310 = dma.done.wait (%p2402_p5), %s203_s27, 1536  }
  0x54   : > { %1312 = vsyncadd (%p2402_p5), %s203_s27, 4294965760  ;;  %s229_s12 = sand.u32 1, %s1324_s10   ;;  %v1354_v0 = vmov 0.0   ;;  %v1515_v1 = vld [vmem:[%s1496_s3] sm:$0xff]  ;;  %v1518_v2 = vld [vmem:[%s1496_s3 + $0x8] sm:$0xff]  ;;  %p986_p2 = scmp.ge.s32.totalorder %s1340_s14, 1 }
  0x55   : > { %s985_s17 = sshll.u32 %s229_s12, 3  ;;  %v1521_v3 = vld [vmem:[%s1496_s3 + $0x10] sm:$0xff]  ;;  %v1524_v4 = vld [vmem:[%s1496_s3 + $0x18] sm:$0xff]  ;;  %v270_v5 = vand.u32 2147483647, %v1515_v1  ;;  %v1528_v6 = vld [vmem:[%s1496_s3 + $0x20] sm:$0xff] }
  0x56   : > { %s1511_s22 = scalar_lea.vmem [#allocation7], %s985_s17  ;;  %2403 = vst [vmem:[#allocation11_spill] sm:$0xff] %v1521_v3  ;;  %2404 = vst [vmem:[#allocation12_spill] sm:$0xff] %v1524_v4  ;;  %v271_v7 = vand.u32 2147483647, %v1518_v2  ;;  %v1532_v8 = vld [vmem:[%s1496_s3 + $0x28] sm:$0xff] }
  0x57   : > { %245 = vst [vmem:[%s1511_s22] sm:$0xff] %v1354_v0  ;;  %2405 = vst [vmem:[#allocation13_spill] sm:$0xff] %v1528_v6  ;;  %v272_v9 = vand.u32 2147483647, %v1521_v3  ;;  %v1536_v10 = vld [vmem:[%s1496_s3 + $0x30] sm:$0xff]  ;;  %v273_v11 = vand.u32 2147483647, %v1524_v4 }
  0x58   : > { %2406 = vst [vmem:[#allocation14_spill] sm:$0xff] %v1532_v8  ;;  %2407 = vst [vmem:[#allocation15_spill] sm:$0xff] %v1536_v10  ;;  %v274_v12 = vand.u32 2147483647, %v1528_v6  ;;  %v282_v13 = vsub.f32 0.0, %v270_v5  ;;  %v1541_v14 = vld [vmem:[%s1496_s3 + $0x38] sm:$0xff] }
  0x59   : > { %2408 = vst [vmem:[#allocation16_spill] sm:$0xff] %v1541_v14  ;;  %v275_v15 = vand.u32 2147483647, %v1532_v8  ;;  %v283_v16 = vsub.f32 0.0, %v271_v7  ;;  %v1545_v17 = vld [vmem:[%s1496_s3 + $0x40] sm:$0xff]  ;;  %v284_v19 = vsub.f32 0.0, %v272_v9 }
  0x5a   : > { %2409 = vst [vmem:[#allocation17_spill] sm:$0xff] %v1545_v17  ;;  %v276_v18 = vand.u32 2147483647, %v1536_v10  ;;  %v285_v20 = vsub.f32 0.0, %v273_v11  ;;  %v1549_v21 = vld [vmem:[%s1496_s3 + $0x48] sm:$0xff]  ;;  %v286_v23 = vsub.f32 0.0, %v274_v12 }
  0x5b   : > { %2410 = vst [vmem:[#allocation18_spill] sm:$0xff] %v1549_v21  ;;  %v277_v22 = vand.u32 2147483647, %v1541_v14  ;;  %v294_v24 = vmul.f32 1.442695, %v282_v13  ;;  %v287_v26 = vsub.f32 0.0, %v275_v15 }
  0x5c   : > { %v278_v25 = vand.u32 2147483647, %v1545_v17  ;;  %v296_v27 = vmul.f32 1.442695, %v283_v16  ;;  %v288_v28 = vsub.f32 0.0, %v276_v18  ;;  %v1554_v30 = vld [vmem:[%s1496_s3 + $0x50] sm:$0xff] }
  0x5d   : > { %v298_v29 = vmul.f32 1.442695, %v284_v19  ;;  %2411 = vst [vmem:[#allocation19_spill] sm:$0xff] %v1554_v30  ;;  %v279_v31 = vand.u32 2147483647, %v1549_v21  ;;  %1091 = vpow2.f32 %v294_v24  ;;  %v1558_v33 = vld [vmem:[%s1496_s3 + $0x58] sm:$0xff] }
  0x5e   : > { %v300_v32 = vmul.f32 1.442695, %v285_v20  ;;  %2412 = vst [vmem:[#allocation20_spill] sm:$0xff] %v1558_v33  ;;  %v289_v34 = vsub.f32 0.0, %v277_v22  ;;  %1093 = vpow2.f32 %v296_v27  ;;  %v302_v35 = vmul.f32 1.442695, %v286_v23 }
  0x5f   : > { %v290_v36 = vsub.f32 0.0, %v278_v25  ;;  %v304_v37 = vmul.f32 1.442695, %v287_v26  ;;  %v280_v38 = vand.u32 2147483647, %v1554_v30  ;;  %1095 = vpow2.f32 %v298_v29  ;;  %v1563_v47 = vld [vmem:[%s1502_s4] sm:$0xff] }
  0x60   : > { %v306_v39 = vmul.f32 1.442695, %v288_v28  ;;  %v281_v40 = vand.u32 2147483647, %v1558_v33  ;;  %v291_v41 = vsub.f32 0.0, %v279_v31  ;;  %1097 = vpow2.f32 %v300_v32  ;;  %v1566_v48 = vld [vmem:[%s1502_s4 + $0x8] sm:$0xff] }
  0x61   : > { %1099 = vpow2.f32 %v302_v35  ;;  %v308_v42 = vmul.f32 1.442695, %v289_v34  ;;  %v310_v43 = vmul.f32 1.442695, %v290_v36  ;;  %v292_v44 = vsub.f32 0.0, %v280_v38  ;;  %v1569_v49 = vld [vmem:[%s1502_s4 + $0x10] sm:$0xff] }
  0x62   : > { %1101 = vpow2.f32 %v304_v37  ;;  %v293_v45 = vsub.f32 0.0, %v281_v40  ;;  %v312_v46 = vmul.f32 1.442695, %v291_v41  ;;  %2413 = vst [vmem:[#allocation21_spill] sm:$0xff] %v1569_v49  ;;  %v318_v50 = vmax.f32 %v1515_v1, 0.0  ;;  %v1574_v52 = vld [vmem:[%s1502_s4 + $0x18] sm:$0xff] }
  0x63   : > { %1103 = vpow2.f32 %v306_v39  ;;  %v319_v51 = vmax.f32 %v1518_v2, 0.0  ;;  %2414 = vst [vmem:[#allocation22_spill] sm:$0xff] %v1574_v52  ;;  %v1577_v53 = vld [vmem:[%s1502_s4 + $0x20] sm:$0xff]  ;;  %v1580_v54 = vld [vmem:[%s1502_s4 + $0x28] sm:$0xff]  ;;  %v330_v55 = vmul.f32 %v1563_v47, %v1515_v1  ;;  %v331_v56 = vmul.f32 %v1566_v48, %v1518_v2  ;;  %v1589_v58 = vld [vmem:[%s1502_s4 + $0x30] sm:$0xff] }
  0x64   : > { %1105 = vpow2.f32 %v308_v42  ;;  %2415 = vst [vmem:[#allocation23_spill] sm:$0xff] %v1577_v53  ;;  %2416 = vst [vmem:[#allocation24_spill] sm:$0xff] %v1580_v54  ;;  %v332_v57 = vmul.f32 %v1569_v49, %v1521_v3  ;;  %v314_v59 = vmul.f32 1.442695, %v292_v44  ;;  %v333_v60 = vmul.f32 %v1574_v52, %v1524_v4  ;;  %v1609_v16 = vld [vmem:[%s1502_s4 + $0x38] sm:$0xff]  ;;  %v1612_v18 = vld [vmem:[%s1502_s4 + $0x40] sm:$0xff] }
  0x65   : > { %1107 = vpow2.f32 %v310_v43  ;;  %2417 = vst [vmem:[#allocation25_spill] sm:$0xff] %v1589_v58  ;;  %v334_v61 = vmul.f32 %v1577_v53, %v1528_v6  ;;  %v335_v62 = vmul.f32 %v1580_v54, %v1532_v8  ;;  %v316_v63 = vmul.f32 1.442695, %v293_v45  ;;  %2420 = vst [vmem:[#allocation28_spill] sm:$0xff] %v1609_v16  ;;  %v1619_v24 = vld [vmem:[%s1502_s4 + $0x48] sm:$0xff]  ;;  %v1622_v25 = vld [vmem:[%s1502_s4 + $0x50] sm:$0xff] }
  0x66   : > { %1109 = vpow2.f32 %v312_v46  ;;  %v320_v0 = vmax.f32 %v1521_v3, 0.0  ;;  %v336_v5 = vmul.f32 %v1589_v58, %v1536_v10  ;;  %v321_v9 = vmax.f32 %v1524_v4, 0.0  ;;  %2421 = vst [vmem:[#allocation29_spill] sm:$0xff] %v1612_v18  ;;  %2422 = vst [vmem:[#allocation30_spill] sm:$0xff] %v1619_v24  ;;  %v1625_v26 = vld [vmem:[%s1502_s4 + $0x58] sm:$0xff] }
  0x67   : > { %v322_v11 = vmax.f32 %v1528_v6, 0.0  ;;  %v323_v12 = vmax.f32 %v1532_v8, 0.0  ;;  %v324_v13 = vmax.f32 %v1536_v10, 0.0  ;;  %v325_v19 = vmax.f32 %v1541_v14, 0.0  ;;  %2423 = vst [vmem:[#allocation31_spill] sm:$0xff] %v1622_v25  ;;  %2424 = vst [vmem:[#allocation32_spill] sm:$0xff] %v1625_v26 }
  0x68   : > { %v326_v20 = vmax.f32 %v1545_v17, 0.0  ;;  %v327_v22 = vmax.f32 %v1549_v21, 0.0  ;;  %v328_v23 = vmax.f32 %v1554_v30, 0.0  ;;  %1111 = vpow2.f32 %v314_v59 }
  0x69   : > { %v329_v27 = vmax.f32 %v1558_v33, 0.0  ;;  %v337_v28 = vmul.f32 %v1609_v16, %v1541_v14  ;;  %v338_v29 = vmul.f32 %v1612_v18, %v1545_v17  ;;  %v339_v32 = vmul.f32 %v1619_v24, %v1549_v21 }
  0x6a   : > { %v1600_v7 = vpop.eup %1091  ;;  %v340_v34 = vmul.f32 %v1622_v25, %v1554_v30  ;;  %v341_v35 = vmul.f32 %v1625_v26, %v1558_v33  ;;  %1113 = vpow2.f32 %v316_v63  ;;  %v1645_v38 = vsub.f32 %v318_v50, %v330_v55 }
  0x6b   : > { %2418 = vst [vmem:[#allocation26_spill] sm:$0xff] %v1600_v7  ;;  %v1606_v15 = vpop.eup %1093  ;;  %v1641_v36 = vadd.f32 1.0, %v1600_v7  ;;  %v1647_v39 = vsub.f32 %v319_v51, %v331_v56  ;;  %v1654_v42 = vsub.f32 %v320_v0, %v332_v57  ;;  %v1656_v43 = vsub.f32 %v321_v9, %v333_v60 }
  0x6c   : > { %2419 = vst [vmem:[#allocation27_spill] sm:$0xff] %v1606_v15  ;;  %v1632_v31 = vpop.eup %1095  ;;  %v1650_v40 = vadd.f32 1.0, %v1606_v15  ;;  %v1658_v44 = vsub.f32 %v322_v11, %v334_v61  ;;  %v1663_v46 = vsub.f32 %v323_v12, %v335_v62  ;;  %v1665_v50 = vsub.f32 %v324_v13, %v336_v5 }
  0x6d   : > { %2425 = vst [vmem:[#allocation33_spill] sm:$0xff] %v1632_v31  ;;  %v1643_v37 = vpop.eup %1097  ;;  %1115 = vlog2.f32 %v1641_v36  ;;  %v1669_v51 = vadd.f32 1.0, %v1632_v31  ;;  %v1673_v56 = vsub.f32 %v325_v19, %v337_v28  ;;  %v1675_v57 = vsub.f32 %v326_v20, %v338_v29 }
  0x6e   : > { %2426 = vst [vmem:[#allocation34_spill] sm:$0xff] %v1643_v37  ;;  %v1652_v41 = vpop.eup %1099  ;;  %1117 = vlog2.f32 %v1650_v40  ;;  %v357_v59 = vmul.f32 -0.5, %v1600_v7  ;;  %v1679_v60 = vadd.f32 1.0, %v1643_v37  ;;  %v366_v61 = vmul.f32 -0.5, %v1606_v15 }
  0x6f   : > { %2427 = vst [vmem:[#allocation35_spill] sm:$0xff] %v1652_v41  ;;  %v1661_v45 = vpop.eup %1101  ;;  %2430 = vst [vmem:[#allocation38_spill] sm:$0xff] %v1673_v56  ;;  %1119 = vlog2.f32 %v1669_v51  ;;  %v375_v62 = vmul.f32 -0.5, %v1632_v31  ;;  %v1685_v63 = vadd.f32 1.0, %v1652_v41  ;;  %v1689_v5 = vsub.f32 %v327_v22, %v339_v32 }
  0x70   : > { %2428 = vst [vmem:[#allocation36_spill] sm:$0xff] %v1661_v45  ;;  %v1671_v55 = vpop.eup %1103  ;;  %2431 = vst [vmem:[#allocation39_spill] sm:$0xff] %v1675_v57  ;;  %v360_v9 = vand.u32 2147483647, %v1600_v7  ;;  %1121 = vlog2.f32 %v1679_v60  ;;  %v1694_v11 = vadd.f32 1.0, %v1661_v45  ;;  %v384_v13 = vmul.f32 -0.5, %v1643_v37 }
  0x71   : > { %2429 = vst [vmem:[#allocation37_spill] sm:$0xff] %v1671_v55  ;;  %v1687_v0 = vpop.eup %1105  ;;  %2433 = vst [vmem:[#allocation41_spill] sm:$0xff] %v1689_v5  ;;  %1123 = vlog2.f32 %v1685_v63  ;;  %v393_v19 = vmul.f32 -0.5, %v1652_v41  ;;  %v1702_v20 = vadd.f32 1.0, %v1671_v55  ;;  %v1704_v22 = vsub.f32 %v328_v23, %v340_v34 }
  0x72   : > { %2432 = vst [vmem:[#allocation40_spill] sm:$0xff] %v1687_v0  ;;  %v1696_v12 = vpop.eup %1107  ;;  %v358_v28 = vadd.f32 1.0, %v357_v59  ;;  %v369_v29 = vand.u32 2147483647, %v1606_v15  ;;  %1125 = vlog2.f32 %v1694_v11  ;;  %v367_v33 = vadd.f32 1.0, %v366_v61 }
  0x73   : > { %2434 = vst [vmem:[#allocation42_spill] sm:$0xff] %v1704_v22  ;;  %v1708_v32 = vpop.eup %1109  ;;  %v376_v30 = vadd.f32 1.0, %v375_v62  ;;  %1127 = vlog2.f32 %v1702_v20  ;;  %v1712_v21 = vadd.f32 1.0, %v1687_v0  ;;  %v1714_v17 = vsub.f32 %v329_v27, %v341_v35 }
  0x74   : > { %v378_v14 = vand.u32 2147483647, %v1632_v31  ;;  %v402_v23 = vmul.f32 -0.5, %v1661_v45  ;;  %v1719_v34 = vadd.f32 1.0, %v1696_v12  ;;  %vm1721_vm0 = vcmp.lt.f32.partialorder %v360_v9, 0.0004427343 }
  0x75   : > { %2435 = vst [vmem:[#allocation43_spill] sm:$0xff] %v1714_v17  ;;  %v385_v61 = vadd.f32 1.0, %v384_v13  ;;  %v387_v62 = vand.u32 2147483647, %v1643_v37  ;;  %v394_v22 = vadd.f32 1.0, %v393_v19  ;;  %1129 = vlog2.f32 %v1712_v21  ;;  %v1727_v10 = vpop.eup %1111 }
  0x76   : > { %v1730_v27 = vmul.f32 %v1600_v7, %v358_v28  ;;  %vm1732_vm1 = vcmp.lt.f32.partialorder %v369_v29, 0.0004427343  ;;  %v411_v9 = vmul.f32 -0.5, %v1671_v55  ;;  %1131 = vlog2.f32 %v1719_v34  ;;  %v2468_v56 = vld [vmem:[#allocation38_spill] sm:$0xff] }
  0x77   : > { %v1739_v13 = vadd.f32 1.0, %v1708_v32  ;;  %v1742_v19 = vmul.f32 %v1606_v15, %v367_v33  ;;  %v1745_v17 = vmul.f32 %v1632_v31, %v376_v30  ;;  %v396_v28 = vand.u32 2147483647, %v1652_v41  ;;  %v1749_v7 = vpop.eup %1113 }
  0x78   : > { %v420_v29 = vmul.f32 -0.5, %v1687_v0  ;;  %vm1751_vm2 = vcmp.lt.f32.partialorder %v378_v14, 0.0004427343  ;;  %v403_v25 = vadd.f32 1.0, %v402_v23  ;;  %v405_v24 = vand.u32 2147483647, %v1661_v45 }
  0x79   : > { %v429_v8 = vmul.f32 -0.5, %v1696_v12  ;;  %1133 = vlog2.f32 %v1739_v13  ;;  %v1759_v30 = vmul.f32 %v1643_v37, %v385_v61  ;;  %vm1761_vm3 = vcmp.lt.f32.partialorder %v387_v62, 0.0004427343  ;;  %v2472_v61 = vld [vmem:[#allocation39_spill] sm:$0xff] }
  0x7a   : > { %v1116_v33 = vpop.eup %1115  ;;  %v1766_v14 = vmul.f32 %v1652_v41, %v394_v22  ;;  %v1769_v15 = vadd.f32 1.0, %v1727_v10  ;;  %v412_v5 = vadd.f32 1.0, %v411_v9  ;;  %v414_v18 = vand.u32 2147483647, %v1671_v55 }
  0x7b   : > { %v1118_v23 = vpop.eup %1117  ;;  %v423_v16 = vand.u32 2147483647, %v1687_v0  ;;  %v438_v58 = vmul.f32 -0.5, %v1708_v32  ;;  %vm1774_vm4 = vcmp.lt.f32.partialorder %v396_v28, 0.0004427343  ;;  %v421_v62 = vadd.f32 1.0, %v420_v29 }
  0x7c   : > { %v432_v37 = vand.u32 2147483647, %v1696_v12  ;;  %1135 = vlog2.f32 %v1769_v15  ;;  %v1781_v22 = vadd.f32 1.0, %v1749_v7  ;;  %v1120_v41 = vpop.eup %1119  ;;  %v356_v9 = vmul.f32 0.6931472, %v1116_v33  ;;  %v2474_v33 = vld [vmem:[#allocation12_spill] sm:$0xff] }
  0x7d   : > { %v1784_v6 = vmul.f32 %v1661_v45, %v403_v25  ;;  %vm1786_vm5 = vcmp.lt.f32.partialorder %v405_v24, 0.0004427343  ;;  %v430_v28 = vadd.f32 1.0, %v429_v8  ;;  %v1122_v53 = vpop.eup %1121  ;;  %v365_v52 = vmul.f32 0.6931472, %v1118_v23  ;;  %v2475_v24 = vld [vmem:[#allocation22_spill] sm:$0xff] }
  0x7e   : > { %2446 = vst [vmem:[#allocation44_spill] sm:$0xff] %v1781_v22  ;;  %v441_v29 = vand.u32 2147483647, %v1708_v32  ;;  %v447_v4 = vmul.f32 -0.5, %v1727_v10  ;;  %1137 = vlog2.f32 %v1781_v22  ;;  %v1124_v57 = vpop.eup %1123  ;;  %v413_v3 = vmul.f32 %v1671_v55, %v412_v5 }
  0x7f   : > { %vm1794_vm6 = vcmp.lt.f32.partialorder %v414_v18, 0.0004427343  ;;  %vm1798_vm7 = vcmp.lt.f32.partialorder %v423_v16, 0.0004427343  ;;  %v439_v8 = vadd.f32 1.0, %v438_v58  ;;  %v1126_v25 = vpop.eup %1125  ;;  %v1803_v45 = vmul.f32 %v1687_v0, %v421_v62 }
  0x80   : > { %v374_v23 = vmul.f32 0.6931472, %v1120_v41  ;;  %vm1805_vm8 = vcmp.lt.f32.partialorder %v432_v37, 0.0004427343  ;;  %v450_v5 = vand.u32 2147483647, %v1727_v10  ;;  %v1128_v18 = vpop.eup %1127  ;;  %v362_v16 = vsel %vm1721_vm0, %v1730_v27, %v356_v9 }
  0x81   : > { %v383_v55 = vmul.f32 0.6931472, %v1122_v53  ;;  %v431_v22 = vmul.f32 %v1696_v12, %v430_v28  ;;  %v456_v58 = vmul.f32 -0.5, %v1749_v7  ;;  %v371_v41 = vsel %vm1732_vm1, %v1742_v19, %v365_v52  ;;  %v2479_v37 = vld [vmem:[#allocation25_spill] sm:$0xff] }
  0x82   : > { %vm1818_vm9 = vcmp.lt.f32.partialorder %v441_v29, 0.0004427343  ;;  %v448_v62 = vadd.f32 1.0, %v447_v4  ;;  %v459_v0 = vand.u32 2147483647, %v1749_v7  ;;  %1139 = vrcp.f32 %v1641_v36  ;;  %v1130_v59 = vpop.eup %1129 }
  0x83   : > { %v392_v27 = vmul.f32 0.6931472, %v1124_v57  ;;  %v401_v53 = vmul.f32 0.6931472, %v1126_v25  ;;  %v440_v9 = vmul.f32 %v1708_v32, %v439_v8  ;;  %1141 = vrcp.f32 %v1650_v40  ;;  %v1132_v28 = vpop.eup %1131  ;;  %v2476_v25 = vld [vmem:[#allocation23_spill] sm:$0xff] }
  0x84   : > { %v380_v52 = vsel %vm1751_vm2, %v1745_v17, %v374_v23  ;;  %v410_v35 = vmul.f32 0.6931472, %v1128_v18  ;;  %vm1829_vm10 = vcmp.lt.f32.partialorder %v450_v5, 0.0004427343  ;;  %1143 = vrcp.f32 %v1669_v51  ;;  %v2477_v5 = vld [vmem:[#allocation24_spill] sm:$0xff] }
  0x85   : > { %v389_v4 = vsel %vm1761_vm3, %v1759_v30, %v383_v55  ;;  %v457_v36 = vadd.f32 1.0, %v456_v58  ;;  %v1838_v57 = vadd.f32 %v362_v16, %v1645_v38  ;;  %1145 = vrcp.f32 %v1679_v60 }
  0x86   : > { %v1134_v40 = vpop.eup %1133  ;;  %v419_v26 = vmul.f32 0.6931472, %v1130_v59  ;;  %v449_v17 = vmul.f32 %v1727_v10, %v448_v62  ;;  %vm1842_vm11 = vcmp.lt.f32.partialorder %v459_v0, 0.0004427343  ;;  %1147 = vrcp.f32 %v1685_v63  ;;  %v2480_v59 = vld [vmem:[#allocation28_spill] sm:$0xff] }
  0x87   : > { %2459 = vst [vmem:[#allocation45_spill] sm:$0xff] %v1838_v57  ;;  %v398_v31 = vsel %vm1774_vm4, %v1766_v14, %v392_v27  ;;  %v407_v38 = vsel %vm1786_vm5, %v1784_v6, %v401_v53  ;;  %v428_v51 = vmul.f32 0.6931472, %v1132_v28  ;;  %1149 = vrcp.f32 %v1694_v11  ;;  %v2481_v53 = vld [vmem:[#allocation29_spill] sm:$0xff]  ;;  %v2504_v57 = vld [vmem:[#allocation34_spill] sm:$0xff] }
  0x88   : > { %v416_v55 = vsel %vm1794_vm6, %v413_v3, %v410_v35  ;;  %v1857_v60 = vadd.f32 %v371_v41, %v1647_v39  ;;  %v1860_v0 = vadd.f32 %v380_v52, %v1654_v42  ;;  %1151 = vrcp.f32 %v1702_v20  ;;  %v2478_v41 = vld [vmem:[#allocation13_spill] sm:$0xff] }
  0x89   : > { %v1136_v63 = vpop.eup %1135  ;;  %v437_v30 = vmul.f32 0.6931472, %v1134_v40  ;;  %v458_v14 = vmul.f32 %v1749_v7, %v457_v36  ;;  %v1865_v6 = vadd.f32 %v389_v4, %v1656_v43  ;;  %1153 = vrcp.f32 %v1712_v21  ;;  %v2483_v52 = vld [vmem:[#allocation41_spill] sm:$0xff]  ;;  %v2485_v4 = vld [vmem:[#allocation14_spill] sm:$0xff]  ;;  %v2488_v40 = vld [vmem:[#allocation31_spill] sm:$0xff] }
  0x8a   : > { %2462 = vst [vmem:[#allocation46_spill] sm:$0xff] %v1857_v60  ;;  %2463 = vst [vmem:[#allocation47_spill] sm:$0xff] %v1860_v0  ;;  %v425_v3 = vsel %vm1798_vm7, %v1803_v45, %v419_v26  ;;  %v1872_v54 = vadd.f32 %v398_v31, %v1658_v44  ;;  %v1875_v39 = vadd.f32 %v407_v38, %v1663_v46  ;;  %1155 = vrcp.f32 %v1719_v34  ;;  %v2486_v36 = vld [vmem:[#allocation30_spill] sm:$0xff] }
  0x8b   : > { %2464 = vst [vmem:[#allocation48_spill] sm:$0xff] %v1865_v6  ;;  %v1138_v42 = vpop.eup %1137  ;;  %v434_v11 = vsel %vm1805_vm8, %v431_v22, %v428_v51  ;;  %v446_v43 = vmul.f32 0.6931472, %v1136_v63  ;;  %v1881_v20 = vadd.f32 %v416_v55, %v1665_v50  ;;  %1157 = vrcp.f32 %v1739_v13  ;;  %v2470_v13 = vld [vmem:[#allocation44_spill] sm:$0xff]  ;;  %v2492_v55 = vld [vmem:[#allocation15_spill] sm:$0xff] }
  0x8c   : > { %2465 = vst [vmem:[#allocation49_spill] sm:$0xff] %v1872_v54  ;;  %2466 = vst [vmem:[#allocation50_spill] sm:$0xff] %v1875_v39  ;;  %vm510_vm12 = vcmp.ge.f32.partialorder %v1515_v1, 0.0  ;;  %1159 = vrcp.f32 %v1769_v15  ;;  %vm511_vm13 = vcmp.ge.f32.partialorder %v1518_v2, 0.0  ;;  %v1888_v21 = vmul.f32 0.25, %v1563_v47  ;;  %v2471_v15 = vld [vmem:[#allocation11_spill] sm:$0xff] }
  0x8d   : > { %2467 = vst [vmem:[#allocation51_spill] sm:$0xff] %v1881_v20  ;;  %v1891_v44 = vmul.f32 0.25, %v1566_v48  ;;  %v1894_v45 = vmul.f32 0.25, %v1569_v49  ;;  %v443_v46 = vsel %vm1818_vm9, %v440_v9, %v437_v30  ;;  %v455_v50 = vmul.f32 0.6931472, %v1138_v42  ;;  %v2502_v39 = vld [vmem:[#allocation33_spill] sm:$0xff] }
  0x8e   : > { %v1899_v34 = vadd.f32 %v425_v3, %v2468_v56  ;;  %1161 = vrcp.f32 %v2470_v13  ;;  %vm512_vm14 = vcmp.ge.f32.partialorder %v2471_v15, 0.0  ;;  %v1904_v22 = vadd.f32 %v434_v11, %v2472_v61  ;;  %v2493_v11 = vld [vmem:[#allocation42_spill] sm:$0xff] }
  0x8f   : > { %vm513_vm15 = vcmp.ge.f32.partialorder %v2474_v33, 0.0  ;;  %v1908_v8 = vmul.f32 0.25, %v2475_v24  ;;  %v1911_v23 = vmul.f32 0.25, %v2476_v25  ;;  %v1914_v18 = vmul.f32 0.25, %v2477_v5  ;;  %v1140_v16 = vpop.eup %1139  ;;  %v2496_v56 = vld [vmem:[#allocation26_spill] sm:$0xff] }
  0x90   : > { %2469 = vst [vmem:[#allocation38_spill] sm:$0xff] %v1899_v34  ;;  %2473 = vst [vmem:[#allocation44_spill] sm:$0xff] %v1904_v22  ;;  %v452_v58 = vsel %vm1829_vm10, %v449_v17, %v446_v43  ;;  %vm514_vm0 = vcmp.ge.f32.partialorder %v2478_v41, 0.0  ;;  %v1920_v62 = vmul.f32 0.25, %v2479_v37  ;;  %v1923_v27 = vmul.f32 0.25, %v2480_v59  ;;  %v1142_v28 = vpop.eup %1141  ;;  %v2490_v17 = vld [vmem:[#allocation32_spill] sm:$0xff] }
  0x91   : > { %v1926_v9 = vmul.f32 0.25, %v2481_v53  ;;  %v1929_v35 = vadd.f32 %v443_v46, %v2483_v52  ;;  %vm515_vm1 = vcmp.ge.f32.partialorder %v2485_v4, 0.0  ;;  %v1933_v19 = vmul.f32 0.25, %v2486_v36  ;;  %v1144_v38 = vpop.eup %1143  ;;  %v2495_v46 = vld [vmem:[#allocation16_spill] sm:$0xff]  ;;  %v2498_v52 = vld [vmem:[#allocation27_spill] sm:$0xff] }
  0x92   : > { %v1936_v26 = vmul.f32 0.25, %v2488_v40  ;;  %v1939_v31 = vmul.f32 0.25, %v2490_v17  ;;  %v461_v51 = vsel %vm1842_vm11, %v458_v14, %v455_v50  ;;  %vm516_vm2 = vcmp.ge.f32.partialorder %v2492_v55, 0.0  ;;  %v1146_v42 = vpop.eup %1145  ;;  %v2497_v50 = vld [vmem:[#allocation17_spill] sm:$0xff]  ;;  %v2519_v55 = vld [vmem:[#allocation28_spill] sm:$0xff] }
  0x93   : > { %2482 = vst [vmem:[#allocation11_spill] sm:$0xff] %v1926_v9  ;;  %2484 = vst [vmem:[#allocation39_spill] sm:$0xff] %v1929_v35  ;;  %v558_v63 = vsub.f32 1.0, %v1563_v47  ;;  %v559_v30 = vsub.f32 1.0, %v1566_v48  ;;  %v560_v3 = vsub.f32 1.0, %v1569_v49  ;;  %v1948_v43 = vadd.f32 %v452_v58, %v2493_v11  ;;  %v1148_v14 = vpop.eup %1147 }
  0x94   : > { %2487 = vst [vmem:[#allocation12_spill] sm:$0xff] %v1933_v19  ;;  %2489 = vst [vmem:[#allocation13_spill] sm:$0xff] %v1936_v26  ;;  %vm517_vm3 = vcmp.ge.f32.partialorder %v2495_v46, 0.0  ;;  %v522_v13 = vmul.f32 %v1140_v16, %v2496_v56  ;;  %v561_v61 = vsub.f32 1.0, %v2475_v24  ;;  %v562_v29 = vsub.f32 1.0, %v2476_v25  ;;  %v1150_v11 = vpop.eup %1149  ;;  %v2501_v56 = vld [vmem:[#allocation18_spill] sm:$0xff] }
  0x95   : > { %2491 = vst [vmem:[#allocation41_spill] sm:$0xff] %v1939_v31  ;;  %2494 = vst [vmem:[#allocation14_spill] sm:$0xff] %v1948_v43  ;;  %vm518_vm4 = vcmp.ge.f32.partialorder %v2497_v50, 0.0  ;;  %v523_v35 = vmul.f32 %v1142_v28, %v2498_v52  ;;  %v563_v22 = vsub.f32 1.0, %v2477_v5  ;;  %v564_v34 = vsub.f32 1.0, %v2479_v37  ;;  %v2499_v43 = vld [vmem:[#allocation43_spill] sm:$0xff]  ;;  %v1152_v60 = vpop.eup %1151 }
  0x96   : > { %v565_v58 = vsub.f32 1.0, %v2480_v59  ;;  %v1960_v20 = vadd.f32 %v461_v51, %v2499_v43  ;;  %vm519_vm5 = vcmp.ge.f32.partialorder %v2501_v56, 0.0  ;;  %v524_v54 = vmul.f32 %v1144_v38, %v2502_v39  ;;  %v2503_v52 = vld [vmem:[#allocation19_spill] sm:$0xff]  ;;  %v1154_v51 = vpop.eup %1153  ;;  %v2505_v43 = vld [vmem:[#allocation20_spill] sm:$0xff]  ;;  %v2520_v46 = vld [vmem:[#allocation29_spill] sm:$0xff] }
  0x97   : > { %v566_v6 = vsub.f32 1.0, %v2481_v53  ;;  %v567_v0 = vsub.f32 1.0, %v2486_v36  ;;  %vm520_vm6 = vcmp.ge.f32.partialorder %v2503_v52, 0.0  ;;  %v525_v31 = vmul.f32 %v1146_v42, %v2504_v57  ;;  %v1156_v25 = vpop.eup %1155  ;;  %v2507_v24 = vld [vmem:[#allocation36_spill] sm:$0xff]  ;;  %v2522_v56 = vld [vmem:[#allocation30_spill] sm:$0xff] }
  0x98   : > { %2500 = vst [vmem:[#allocation15_spill] sm:$0xff] %v1960_v20  ;;  %v568_v26 = vsub.f32 1.0, %v2488_v40  ;;  %v569_v59 = vsub.f32 1.0, %v2490_v17  ;;  %v570_v37 = vmul.f32 0.75, %v558_v63  ;;  %vm521_vm7 = vcmp.ge.f32.partialorder %v2505_v43, 0.0  ;;  %v2506_v20 = vld [vmem:[#allocation35_spill] sm:$0xff]  ;;  %v1158_v17 = vpop.eup %1157 }
  0x99   : > { %v526_v5 = vmul.f32 %v1148_v14, %v2506_v20  ;;  %v534_v39 = vsel %vm510_vm12, %v1140_v16, %v522_v13  ;;  %v571_v53 = vmul.f32 0.75, %v559_v30  ;;  %v572_v36 = vmul.f32 0.75, %v560_v3  ;;  %v2508_v63 = vld [vmem:[#allocation37_spill] sm:$0xff]  ;;  %v1160_v1 = vpop.eup %1159  ;;  %v2509_v16 = vld [vmem:[#allocation40_spill] sm:$0xff] }
  0x9a   : > { %v527_v19 = vmul.f32 %v1150_v11, %v2507_v24  ;;  %v535_v57 = vsel %vm511_vm13, %v1142_v28, %v523_v35  ;;  %v573_v40 = vmul.f32 0.75, %v561_v61  ;;  %v574_v9 = vmul.f32 0.75, %v562_v29 }
  0x9b   : > { %v528_v52 = vmul.f32 %v1152_v60, %v2508_v63  ;;  %v536_v43 = vsel %vm512_vm14, %v1144_v38, %v524_v54  ;;  %v575_v20 = vmul.f32 0.75, %v563_v22  ;;  %v576_v49 = vmul.f32 0.75, %v564_v34  ;;  %v1162_v2 = vpop.eup %1161 }
  0x9c   : > { %v529_v30 = vmul.f32 %v1154_v51, %v2509_v16  ;;  %v537_v3 = vsel %vm513_vm15, %v1146_v42, %v525_v31  ;;  %v577_v24 = vmul.f32 0.75, %v565_v58  ;;  %v578_v13 = vmul.f32 0.75, %v566_v6  ;;  %v2517_v31 = vld [vmem:[#allocation24_spill] sm:$0xff]  ;;  %v2521_v58 = vld [vmem:[#allocation13_spill] sm:$0xff] }
  0x9d   : > { %v530_v28 = vmul.f32 %v1156_v25, %v1696_v12  ;;  %v538_v35 = vsel %vm514_vm0, %v1148_v14, %v526_v5  ;;  %v579_v61 = vmul.f32 0.75, %v567_v0  ;;  %v580_v29 = vmul.f32 0.75, %v568_v26  ;;  %v2516_v26 = vld [vmem:[#allocation23_spill] sm:$0xff] }
  0x9e   : > { %v531_v54 = vmul.f32 %v1158_v17, %v1708_v32  ;;  %v539_v34 = vsel %vm515_vm1, %v1150_v11, %v527_v19  ;;  %v581_v15 = vmul.f32 0.75, %v569_v59  ;;  %v582_v22 = vadd.f32 %v570_v37, %v1888_v21  ;;  %v2513_v19 = vld [vmem:[#allocation12_spill] sm:$0xff] }
  0x9f   : > { %v532_v33 = vmul.f32 %v1160_v1, %v1727_v10  ;;  %v540_v6 = vsel %vm516_vm2, %v1152_v60, %v528_v52  ;;  %v583_v12 = vadd.f32 %v571_v53, %v1891_v44  ;;  %v584_v41 = vadd.f32 %v572_v36, %v1894_v45  ;;  %v2510_v53 = vld [vmem:[#allocation21_spill] sm:$0xff]  ;;  %v2512_v36 = vld [vmem:[#allocation11_spill] sm:$0xff] }
  0xa0   : > { %v533_v0 = vmul.f32 %v1162_v2, %v1749_v7  ;;  %v541_v32 = vsel %vm517_vm3, %v1154_v51, %v529_v30  ;;  %v585_v5 = vadd.f32 %v573_v40, %v1908_v8  ;;  %v594_v59 = vsub.f32 %v1563_v47, %v534_v39  ;;  %v2523_v51 = vld [vmem:[#allocation31_spill] sm:$0xff]  ;;  %v2526_v30 = vld [vmem:[#allocation45_spill] sm:$0xff] }
  0xa1   : > { %v542_v21 = vsel %vm518_vm4, %v1156_v25, %v530_v28  ;;  %v586_v10 = vadd.f32 %v574_v9, %v1911_v23  ;;  %v587_v60 = vadd.f32 %v575_v20, %v1914_v18  ;;  %v595_v44 = vsub.f32 %v1566_v48, %v535_v57  ;;  %v2514_v9 = vld [vmem:[#allocation22_spill] sm:$0xff]  ;;  %v2524_v57 = vld [vmem:[#allocation41_spill] sm:$0xff]  ;;  %v2525_v20 = vld [vmem:[#allocation32_spill] sm:$0xff] }
  0xa2   : > { %v543_v45 = vsel %vm519_vm5, %v1158_v17, %v531_v54  ;;  %v588_v7 = vadd.f32 %v576_v49, %v1920_v62  ;;  %v589_v37 = vadd.f32 %v577_v24, %v1923_v27  ;;  %v596_v8 = vsub.f32 %v2510_v53, %v536_v43  ;;  %v2518_v27 = vld [vmem:[#allocation25_spill] sm:$0xff] }
  0xa3   : > { %v544_v47 = vsel %vm520_vm6, %v1160_v1, %v532_v33  ;;  %v590_v25 = vadd.f32 %v578_v13, %v2512_v36  ;;  %v591_v23 = vadd.f32 %v579_v61, %v2513_v19  ;;  %v597_v18 = vsub.f32 %v2514_v9, %v537_v3 }
  0xa4   : > { %v545_v48 = vsel %vm521_vm7, %v1162_v2, %v533_v0  ;;  %v598_v17 = vsub.f32 %v2516_v26, %v538_v35  ;;  %v599_v49 = vsub.f32 %v2517_v31, %v539_v34  ;;  %v2019_v62 = vand.u32 2147483647, %v594_v59  ;;  %v2527_v2 = vld [vmem:[#allocation46_spill] sm:$0xff]  ;;  %v2530_v0 = vld [vmem:[#allocation49_spill] sm:$0xff] }
  0xa5   : > { %v600_v38 = vsub.f32 %v2518_v27, %v540_v6  ;;  %v601_v42 = vsub.f32 %v2519_v55, %v541_v32  ;;  %v602_v14 = vsub.f32 %v2520_v46, %v542_v21  ;;  %v2024_v50 = vand.u32 2147483647, %v595_v44  ;;  %v2529_v6 = vld [vmem:[#allocation48_spill] sm:$0xff]  ;;  %v2531_v59 = vld [vmem:[#allocation50_spill] sm:$0xff]  ;;  %v2532_v44 = vld [vmem:[#allocation51_spill] sm:$0xff] }
  0xa6   : > { %v592_v11 = vadd.f32 %v580_v29, %v2521_v58  ;;  %v603_v52 = vsub.f32 %v2522_v56, %v543_v45  ;;  %v604_v43 = vsub.f32 %v2523_v51, %v544_v47  ;;  %v2029_v39 = vand.u32 2147483647, %v596_v8  ;;  %v2534_v8 = vld [vmem:[#allocation44_spill] sm:$0xff] }
  0xa7   : > { %v593_v63 = vadd.f32 %v581_v15, %v2524_v57  ;;  %v605_v1 = vsub.f32 %v2525_v20, %v545_v48  ;;  %v2033_v16 = vand.u32 2147483647, %v597_v18  ;;  %v2036_v3 = vmul.f32 %v582_v22, %v2526_v30  ;;  %v2528_v15 = vld [vmem:[#allocation47_spill] sm:$0xff] }
  0xa8   : > { %v2038_v24 = vand.u32 2147483647, %v598_v17  ;;  %v2040_v13 = vand.u32 2147483647, %v599_v49  ;;  %v2043_v28 = vmul.f32 %v583_v12, %v2527_v2  ;;  %1163 = vrsqrt.f32 %v2019_v62 }
  0xa9   : > { %v2046_v35 = vand.u32 2147483647, %v600_v38  ;;  %v2048_v61 = vand.u32 2147483647, %v601_v42  ;;  %v2050_v29 = vand.u32 2147483647, %v602_v14  ;;  %1165 = vrsqrt.f32 %v2024_v50 }
  0xaa   : > { %v2053_v54 = vand.u32 2147483647, %v603_v52  ;;  %v2055_v34 = vand.u32 2147483647, %v604_v43  ;;  %v2058_v22 = vmul.f32 %v584_v41, %v2528_v15  ;;  %1167 = vrsqrt.f32 %v2029_v39  ;;  %v2533_v41 = vld [vmem:[#allocation38_spill] sm:$0xff] }
  0xab   : > { %v2061_v33 = vand.u32 2147483647, %v605_v1  ;;  %v2064_v12 = vmul.f32 %v585_v5, %v2529_v6  ;;  %v2067_v32 = vmul.f32 %v586_v10, %v2530_v0  ;;  %1169 = vrsqrt.f32 %v2033_v16  ;;  %v2535_v5 = vld [vmem:[#allocation39_spill] sm:$0xff]  ;;  %v2536_v10 = vld [vmem:[#allocation14_spill] sm:$0xff] }
  0xac   : > { %v2071_v21 = vmul.f32 %v587_v60, %v2531_v59  ;;  %v2074_v45 = vmul.f32 %v588_v7, %v2532_v44  ;;  %v2077_v53 = vmul.f32 %v589_v37, %v2533_v41  ;;  %1171 = vrsqrt.f32 %v2038_v24  ;;  %v2537_v60 = vld [vmem:[#allocation15_spill] sm:$0xff] }
  0xad   : > { %v2081_v4 = vmul.f32 %v590_v25, %v2534_v8  ;;  %v2084_v47 = vmul.f32 %v591_v23, %v2535_v5  ;;  %v2087_v36 = vmul.f32 %v592_v11, %v2536_v10  ;;  %1173 = vrsqrt.f32 %v2040_v13 }
  0xae   : > { %v2091_v19 = vmul.f32 %v593_v63, %v2537_v60  ;;  %vm632_vm8 = vcmp.eq.f32.partialorder %v2019_v62, inf  ;;  %vm634_vm9 = vcmp.eq.f32.partialorder %v2019_v62, 0.0  ;;  %1175 = vrsqrt.f32 %v2046_v35 }
  0xaf   : > { %v635_v7 = vand.u32 2147483648, %v2019_v62  ;;  %vm639_vm10 = vcmp.eq.f32.partialorder %v2024_v50, inf  ;;  %vm641_vm11 = vcmp.eq.f32.partialorder %v2024_v50, 0.0  ;;  %1177 = vrsqrt.f32 %v2048_v61 }
  0xb0   : > { %v642_v37 = vand.u32 2147483648, %v2024_v50  ;;  %vm646_vm12 = vcmp.eq.f32.partialorder %v2029_v39, inf  ;;  %vm648_vm13 = vcmp.eq.f32.partialorder %v2029_v39, 0.0  ;;  %1179 = vrsqrt.f32 %v2050_v29 }
  0xb1   : > { %v649_v25 = vand.u32 2147483648, %v2029_v39  ;;  %vm653_vm14 = vcmp.eq.f32.partialorder %v2033_v16, inf  ;;  %vm655_vm15 = vcmp.eq.f32.partialorder %v2033_v16, 0.0  ;;  %1181 = vrsqrt.f32 %v2053_v54 }
  0xb2   : > { %v656_v23 = vand.u32 2147483648, %v2033_v16  ;;  %vm660_vm0 = vcmp.eq.f32.partialorder %v2038_v24, inf  ;;  %vm662_vm1 = vcmp.eq.f32.partialorder %v2038_v24, 0.0  ;;  %1183 = vrsqrt.f32 %v2055_v34 }
  0xb3   : > { %v663_v9 = vand.u32 2147483648, %v2038_v24  ;;  %1185 = vrsqrt.f32 %v2061_v33  ;;  %v670_v18 = vand.u32 2147483648, %v2040_v13  ;;  %vm674_vm4 = vcmp.eq.f32.partialorder %v2046_v35, inf }
  0xb4   : > { %v677_v40 = vand.u32 2147483648, %v2046_v35  ;;  %v684_v26 = vand.u32 2147483648, %v2048_v61  ;;  %vm688_vm2 = vcmp.eq.f32.partialorder %v2050_v29, inf  ;;  %v691_v49 = vand.u32 2147483648, %v2050_v29 }
  0xb5   : > { %v1164_v48 = vpop.eup %1163  ;;  %vm697_vm6 = vcmp.eq.f32.partialorder %v2053_v54, 0.0  ;;  %v698_v55 = vand.u32 2147483648, %v2053_v54  ;;  %vm702_vm7 = vcmp.eq.f32.partialorder %v2055_v34, inf  ;;  %vm704_vm3 = vcmp.eq.f32.partialorder %v2055_v34, 0.0 }
  0xb6   : > { %v1166_v17 = vpop.eup %1165  ;;  %v631_v31 = vmul.f32 %v1164_v48, %v2019_v62  ;;  %v705_v58 = vand.u32 2147483648, %v2055_v34  ;;  %vm709_vm5 = vcmp.eq.f32.partialorder %v2061_v33, inf  ;;  %v712_v43 = vand.u32 2147483648, %v2061_v33 }
  0xb7   : > { %v1168_v27 = vpop.eup %1167  ;;  %v638_v38 = vmul.f32 %v1166_v17, %v2024_v50 }
  0xb8   : > { %v1170_v42 = vpop.eup %1169  ;;  %v633_v46 = vsel %vm632_vm8, %v2019_v62, %v631_v31  ;;  %v645_v14 = vmul.f32 %v1168_v27, %v2029_v39  ;;  %vm711_vm8 = vcmp.eq.f32.partialorder %v2061_v33, 0.0 }
  0xb9   : > { %v1172_v11 = vpop.eup %1171  ;;  %v636_v56 = vsel %vm634_vm9, %v635_v7, %v633_v46  ;;  %v640_v52 = vsel %vm639_vm10, %v2024_v50, %v638_v38  ;;  %v652_v51 = vmul.f32 %v1170_v42, %v2033_v16  ;;  %vm2538_vm9 = vcmp.eq.f32.partialorder %v2040_v13, inf }
  0xba   : > { %v1174_v57 = vpop.eup %1173  ;;  %v643_v63 = vsel %vm641_vm11, %v642_v37, %v640_v52  ;;  %v647_v20 = vsel %vm646_vm12, %v2029_v39, %v645_v14  ;;  %v659_v1 = vmul.f32 %v1172_v11, %v2038_v24  ;;  %v714_v30 = vmul.f32 %v636_v56, %v2019_v62 }
  0xbb   : > { %v1176_v2 = vpop.eup %1175  ;;  %v650_v15 = vsel %vm648_vm13, %v649_v25, %v647_v20  ;;  %v654_v6 = vsel %vm653_vm14, %v2033_v16, %v652_v51  ;;  %v666_v0 = vmul.f32 %v1174_v57, %v2040_v13  ;;  %v715_v59 = vmul.f32 %v643_v63, %v2024_v50 }
  0xbc   : > { %v1178_v44 = vpop.eup %1177  ;;  %v657_v41 = vsel %vm655_vm15, %v656_v23, %v654_v6  ;;  %v661_v62 = vsel %vm660_vm0, %v2038_v24, %v659_v1  ;;  %v673_v8 = vmul.f32 %v1176_v2, %v2046_v35  ;;  %v716_v5 = vmul.f32 %v650_v15, %v2029_v39 }
  0xbd   : > { %v1180_v10 = vpop.eup %1179  ;;  %v664_v60 = vsel %vm662_vm1, %v663_v9, %v661_v62  ;;  %v668_v50 = vsel %vm2538_vm9, %v2040_v13, %v666_v0  ;;  %v680_v7 = vmul.f32 %v1178_v44, %v2048_v61  ;;  %v717_v37 = vmul.f32 %v657_v41, %v2033_v16 }
  0xbe   : > { %v1182_v25 = vpop.eup %1181  ;;  %vm2539_vm10 = vcmp.eq.f32.partialorder %v2040_v13, 0.0  ;;  %v675_v39 = vsel %vm674_vm4, %v2046_v35, %v673_v8  ;;  %v687_v48 = vmul.f32 %v1180_v10, %v2050_v29  ;;  %v718_v9 = vmul.f32 %v664_v60, %v2038_v24 }
  0xbf   : > { %v671_v23 = vsel %vm2539_vm10, %v670_v18, %v668_v50  ;;  %v1184_v17 = vpop.eup %1183  ;;  %vm2540_vm11 = vcmp.eq.f32.partialorder %v2046_v35, 0.0  ;;  %vm2541_vm12 = vcmp.eq.f32.partialorder %v2048_v61, inf  ;;  %v694_v27 = vmul.f32 %v1182_v25, %v2053_v54 }
  0xc0   : > { %v678_v31 = vsel %vm2540_vm11, %v677_v40, %v675_v39  ;;  %v682_v16 = vsel %vm2541_vm12, %v2048_v61, %v680_v7  ;;  %v719_v18 = vmul.f32 %v671_v23, %v2040_v13  ;;  %v1186_v38 = vpop.eup %1185  ;;  %vm2542_vm13 = vcmp.eq.f32.partialorder %v2048_v61, 0.0 }
  0xc1   : > { %v685_v42 = vsel %vm2542_vm13, %v684_v26, %v682_v16  ;;  %v689_v24 = vsel %vm688_vm2, %v2050_v29, %v687_v48  ;;  %v701_v46 = vmul.f32 %v1184_v17, %v2055_v34  ;;  %v720_v40 = vmul.f32 %v678_v31, %v2046_v35 }
  0xc2   : > { %vm2543_vm14 = vcmp.eq.f32.partialorder %v2050_v29, 0.0  ;;  %vm2544_vm15 = vcmp.eq.f32.partialorder %v2053_v54, inf  ;;  %v708_v13 = vmul.f32 %v1186_v38, %v2061_v33  ;;  %v721_v56 = vmul.f32 %v685_v42, %v2048_v61 }
  0xc3   : > { %v692_v14 = vsel %vm2543_vm14, %v691_v49, %v689_v24  ;;  %v696_v11 = vsel %vm2544_vm15, %v2053_v54, %v694_v27  ;;  %v703_v52 = vsel %vm702_vm7, %v2055_v34, %v701_v46  ;;  %v2210_v51 = vmul.f32 %v714_v30, %v2036_v3 }
  0xc4   : > { %v699_v26 = vsel %vm697_vm6, %v698_v55, %v696_v11  ;;  %v722_v35 = vmul.f32 %v692_v14, %v2050_v29  ;;  %v706_v49 = vsel %vm704_vm3, %v705_v58, %v703_v52  ;;  %v710_v57 = vsel %vm709_vm5, %v2061_v33, %v708_v13  ;;  %741 = sbr.rel (%p986_p2) target bundleno = 238 (0xee), region = 44 }
  0xc5   : > { %v723_v61 = vmul.f32 %v699_v26, %v2053_v54  ;;  %v2219_v55 = vmul.f32 %v715_v59, %v2043_v28  ;;  %v713_v63 = vsel %vm711_vm8, %v712_v43, %v710_v57  ;;  %v724_v29 = vmul.f32 %v706_v49, %v2055_v34 }
  0xc6   : > { %v2225_v3 = vmul.f32 %v716_v5, %v2058_v22  ;;  %v2228_v20 = vmul.f32 %v717_v37, %v2064_v12  ;;  %v725_v58 = vmul.f32 %v713_v63, %v2061_v33  ;;  %v2232_v1 = vmul.f32 %v718_v9, %v2067_v32 }
  0xc7   : > { %v2235_v54 = vmul.f32 %v719_v18, %v2071_v21  ;;  %v2238_v28 = vmul.f32 %v720_v40, %v2074_v45  ;;  %v2241_v43 = vmul.f32 %v721_v56, %v2077_v53  ;;  %v2244_v34 = vmul.f32 %v722_v35, %v2081_v4 }
  0xc8   : > { %v2247_v22 = vmul.f32 %v723_v61, %v2084_v47  ;;  %v2250_v33 = vmul.f32 %v724_v29, %v2087_v36  ;;  %v2253_v12 = vmul.f32 %v725_v58, %v2091_v19 }
  0xc9   : > { %v743_v32 = vadd.f32 %v2219_v55, %v2210_v51  ;;  %v742_v62 = vld [vmem:[%s1511_s22] sm:$0x1] }
  0xcb   : > { %v744_v21 = vadd.f32 %v743_v32, %v2225_v3 }
  0xcd   : > { %v745_v45 = vadd.f32 %v744_v21, %v2228_v20 }
  0xcf   : > { %v746_v53 = vadd.f32 %v745_v45, %v2232_v1 }
  0xd1   : > { %v747_v4 = vadd.f32 %v746_v53, %v2235_v54 }
  0xd3   : > { %v748_v47 = vadd.f32 %v747_v4, %v2238_v28 }
  0xd5   : > { %v749_v36 = vadd.f32 %v748_v47, %v2241_v43 }
  0xd7   : > { %v750_v19 = vadd.f32 %v749_v36, %v2244_v34 }
  0xd9   : > { %v751_v30 = vadd.f32 %v750_v19, %v2247_v22 }
  0xdb   : > { %v752_v2 = vadd.f32 %v751_v30, %v2250_v33 }
  0xdd   : > { %v753_v15 = vadd.f32 %v752_v2, %v2253_v12 }
  0xdf   : > { %v754_v6 = vrot.slane %v753_v15, 4 }
  0xe1   : > { %v755_v0 = vadd.f32 %v754_v6, %v753_v15 }
  0xe3   : > { %v756_v59 = vrot.slane %v755_v0, 2 }
  0xe5   : > { %v757_v44 = vadd.f32 %v756_v59, %v755_v0 }
  0xe7   : > { %v758_v41 = vrot.slane %v757_v44, 1 }
  0xe9   : > { %v759_v8 = vadd.f32 %v758_v41, %v757_v44 }
  0xeb   : > { %v760_v5 = vadd.f32 %v759_v8, %v742_v62 }
  0xed   : > { %761 = vst [vmem:[%s1511_s22] sm:$0x1] %v760_v5 }
  0xee PF: > { %p987_p7 = scmp.lt.s32.totalorder %s1340_s14, 1 }
  0xef   : > { %s781_s21 = smul.u32 (!%p987_p7), 96, %s1340_s14 }
  0xf0   : > { %765 = sbr.rel (%p987_p7) target bundleno = 297 (0x129), region = 48 }
  0xf5   : > { %v766_v10 = vlaneseq  ;;  %v782_v50 = vstv %s781_s21 }
  0xf7   : > { %v767_v60 = vshrl.u32 %v766_v10, 7  ;;  %v780_v31 = vand.u32 127, %v766_v10 }
  0xf9   : > { %v768_v7 = vadd.s32 8, %v767_v60  ;;  %v769_v37 = vadd.s32 16, %v767_v60  ;;  %v770_v25 = vadd.s32 24, %v767_v60  ;;  %v771_v23 = vadd.s32 32, %v767_v60 }
  0xfa   : > { %v783_v39 = vadd.s32 %v782_v50, %v767_v60  ;;  %v772_v17 = vadd.s32 40, %v767_v60  ;;  %v773_v18 = vadd.s32 48, %v767_v60  ;;  %v774_v46 = vadd.s32 56, %v767_v60 }
  0xfb   : > { %v784_v48 = vadd.s32 %v782_v50, %v768_v7  ;;  %v785_v9 = vadd.s32 %v782_v50, %v769_v37  ;;  %v786_v16 = vadd.s32 %v782_v50, %v770_v25  ;;  %v787_v38 = vadd.s32 %v782_v50, %v771_v23 }
  0xfc   : > { %v795_v27 = vmul.u32 128, %v783_v39  ;;  %v788_v40 = vadd.s32 %v782_v50, %v772_v17  ;;  %v775_v56 = vadd.s32 64, %v767_v60  ;;  %v789_v26 = vadd.s32 %v782_v50, %v773_v18 }
  0xfd   : > { %v796_v42 = vmul.u32 128, %v784_v48  ;;  %v797_v24 = vmul.u32 128, %v785_v9  ;;  %v776_v49 = vadd.s32 72, %v767_v60  ;;  %v790_v57 = vadd.s32 %v782_v50, %v774_v46  ;;  %v843_v46 = vld [vmem:[%s1511_s22] sm:$0x1] }
  0xfe   : > { %v798_v14 = vmul.u32 128, %v786_v16  ;;  %v807_v11 = vadd.s32 %v795_v27, %v780_v31  ;;  %v799_v52 = vmul.u32 128, %v787_v38  ;;  %v777_v29 = vadd.s32 80, %v767_v60 }
  0xff   : > { %v808_v13 = vadd.s32 %v796_v42, %v780_v31  ;;  %v809_v35 = vadd.s32 %v797_v24, %v780_v31  ;;  %v800_v61 = vmul.u32 128, %v788_v40  ;;  %v791_v58 = vadd.s32 %v782_v50, %v775_v56 }
 0x100   : > { %v810_v63 = vadd.s32 %v798_v14, %v780_v31  ;;  %vm819_vm0 = vcmp.lt.s32.totalorder %v807_v11, 12288  ;;  %v801_v32 = vmul.u32 128, %v789_v26  ;;  %v811_v21 = vadd.s32 %v799_v52, %v780_v31 }
 0x101   : > { %vm820_vm1 = vcmp.lt.s32.totalorder %v808_v13, 12288  ;;  %vm821_vm2 = vcmp.lt.s32.totalorder %v809_v35, 12288  ;;  %v778_v45 = vadd.s32 88, %v767_v60  ;;  %v831_v53 = vsel %vm819_vm0, %v2210_v51, 0.0 }
 0x102   : > { %v832_v4 = vsel %vm820_vm1, %v2219_v55, 0.0  ;;  %v792_v47 = vadd.s32 %v782_v50, %v776_v49  ;;  %v802_v36 = vmul.u32 128, %v790_v57  ;;  %v812_v19 = vadd.s32 %v800_v61, %v780_v31 }
 0x103   : > { %vm822_vm3 = vcmp.lt.s32.totalorder %v810_v63, 12288  ;;  %v793_v30 = vadd.s32 %v782_v50, %v777_v29  ;;  %v833_v2 = vsel %vm821_vm2, %v2225_v3, 0.0  ;;  %v803_v15 = vmul.u32 128, %v791_v58 }
 0x104   : > { %v813_v6 = vadd.s32 %v801_v32, %v780_v31  ;;  %vm823_vm4 = vcmp.lt.s32.totalorder %v811_v21, 12288  ;;  %v844_v0 = vadd.f32 %v832_v4, %v831_v53  ;;  %v794_v59 = vadd.s32 %v782_v50, %v778_v45 }
 0x105   : > { %v834_v44 = vsel %vm822_vm3, %v2228_v20, 0.0  ;;  %v804_v41 = vmul.u32 128, %v792_v47  ;;  %v814_v62 = vadd.s32 %v802_v36, %v780_v31  ;;  %vm824_vm5 = vcmp.lt.s32.totalorder %v812_v19, 12288 }
 0x106   : > { %v845_v51 = vadd.f32 %v844_v0, %v833_v2  ;;  %v835_v55 = vsel %vm823_vm4, %v2232_v1, 0.0  ;;  %v805_v8 = vmul.u32 128, %v793_v30  ;;  %v815_v5 = vadd.s32 %v803_v15, %v780_v31 }
 0x107   : > { %vm825_vm6 = vcmp.lt.s32.totalorder %v813_v6, 12288  ;;  %v836_v60 = vsel %vm824_vm5, %v2235_v54, 0.0  ;;  %v806_v3 = vmul.u32 128, %v794_v59  ;;  %v816_v7 = vadd.s32 %v804_v41, %v780_v31 }
 0x108   : > { %v846_v10 = vadd.f32 %v845_v51, %v834_v44  ;;  %vm826_vm7 = vcmp.lt.s32.totalorder %v814_v62, 12288  ;;  %v837_v50 = vsel %vm825_vm6, %v2238_v28, 0.0  ;;  %v817_v25 = vadd.s32 %v805_v8, %v780_v31 }
 0x109   : > { %vm827_vm8 = vcmp.lt.s32.totalorder %v815_v5, 12288  ;;  %v838_v23 = vsel %vm826_vm7, %v2241_v43, 0.0  ;;  %v818_v39 = vadd.s32 %v806_v3, %v780_v31  ;;  %vm828_vm9 = vcmp.lt.s32.totalorder %v816_v7, 12288 }
 0x10a   : > { %v847_v37 = vadd.f32 %v846_v10, %v835_v55  ;;  %v839_v48 = vsel %vm827_vm8, %v2244_v34, 0.0  ;;  %vm829_vm10 = vcmp.lt.s32.totalorder %v817_v25, 12288  ;;  %v840_v54 = vsel %vm828_vm9, %v2247_v22, 0.0 }
 0x10b   : > { %vm830_vm11 = vcmp.lt.s32.totalorder %v818_v39, 12288  ;;  %v841_v28 = vsel %vm829_vm10, %v2250_v33, 0.0 }
 0x10c   : > { %v848_v20 = vadd.f32 %v847_v37, %v836_v60  ;;  %v842_v27 = vsel %vm830_vm11, %v2253_v12, 0.0 }
 0x10e   : > { %v849_v1 = vadd.f32 %v848_v20, %v837_v50 }
 0x110   : > { %v850_v9 = vadd.f32 %v849_v1, %v838_v23 }
 0x112   : > { %v851_v17 = vadd.f32 %v850_v9, %v839_v48 }
 0x114   : > { %v852_v16 = vadd.f32 %v851_v17, %v840_v54 }
 0x116   : > { %v853_v18 = vadd.f32 %v852_v16, %v841_v28 }
 0x118   : > { %v854_v43 = vadd.f32 %v853_v18, %v842_v27 }
 0x11a   : > { %v855_v31 = vrot.slane %v854_v43, 4 }
 0x11c   : > { %v856_v38 = vadd.f32 %v855_v31, %v854_v43 }
 0x11e   : > { %v857_v42 = vrot.slane %v856_v38, 2 }
 0x120   : > { %v858_v24 = vadd.f32 %v857_v42, %v856_v38 }
 0x122   : > { %v859_v34 = vrot.slane %v858_v24, 1 }
 0x124   : > { %v860_v40 = vadd.f32 %v859_v34, %v858_v24 }
 0x126   : > { %v861_v14 = vadd.f32 %v860_v40, %v843_v46 }
 0x128   : > { %862 = vst [vmem:[%s1511_s22] sm:$0x1] %v861_v14 }
 0x129 PF: > { %s989_s28 = sshll.u32 %s1340_s14, 7  ;;  %s877_s7 = sshll.u32 %s1511_s22, 4  ;;  %s878_s7 = int_to_ptr.vmem [resolvable:$true] %s877_s7 }
 0x12a   : > { %s875_s29 = scalar_lea.hbm %s2335_s2, %s989_s28  ;;  %s864_s8 = scalar_lea.sflag [#allocation4], %s229_s12 }
 0x12b   : > { %s1243_s18 = scalar_lea.vmem %s878_s7, 128  ;;  %p2545_p13 = scmp.ne.s32.totalorder %s2397_s25, 0 }
 0x12c   : > { %p1244_p12 = scmp.ne.s32.totalorder %s878_s7, %s1243_s18  ;;  %s1355_s20 = smov [#allocation7]  }
 0x12d   : > { %s1247_s23 = sshll.u32 %s1355_s20, 4  ;;  %s1248_s23 = int_to_ptr.vmem [resolvable:$false] %s1247_s23 }
 0x12e   : > { %p1245_p0 = pnand %p1244_p12, %p2545_p13  ;;  %s1249_s30 = scalar_lea.vmem %s1248_s23, 256 }
 0x12f   : > { %p1250_p9 = scmp.lt.s32.totalorder %s878_s7, %s1248_s23  ;;  %p1251_p10 = scmp.lt.s32.totalorder %s1249_s30, %s1243_s18 }
 0x130   : > { %p1246_p8 = pneg %p1245_p0 }
 0x131   : > { %p1252_p11 = por %p1251_p10, %p1250_p9 }
 0x133   : > { %p1253_p1 = pnand %p1252_p11, %p1246_p8 }
 0x135   : > { %1256 = shalt.err (!%p1253_p1)
}
 0x136   : > { %s1257_s14 = scalar_lea.hbm %s875_s29, 128  ;;  %s1261_s4 = scalar_lea.hbm %s2335_s2, 256 }
 0x137   : > { %p1258_p3 = scmp.ne.s32.totalorder %s875_s29, %s1257_s14  ;;  %p1262_p5 = scmp.lt.s32.totalorder %s875_s29, %s2335_s2 }
 0x138   : > { %p1263_p2 = scmp.lt.s32.totalorder %s1261_s4, %s1257_s14 }
 0x139   : > { %p1259_p4 = pnand %p1258_p3, %p2545_p13 }
 0x13a   : > { %p1264_p7 = por %p1263_p2, %p1262_p5 }
 0x13b   : > { %p1260_p6 = pneg %p1259_p4 }
 0x13d   : > { %p1265_p12 = pnand %p1264_p7, %p1260_p6 }
 0x13f   : > { %1268 = shalt.err (!%p1265_p12)
}
 0x140   : > { %1001 = dma.vmem_to_hbm [thread:$0]  (%p2545_p13), %s878_s7, 128, %s875_s29, %s864_s8  }
 0x141 PF: > { %s889_s22 = sand.u32 1, %s1320_s9   ;;  %p2546_p0 = scmp.ne.s32.totalorder %s2398_s26, 0 }
 0x142   : > { %p2547_p8 = scmp.ge.s32.totalorder %s1348_s16, 2  ;;  %s890_s21 = scalar_lea.sflag [#allocation4], %s889_s22 }
 0x144   : > { %p1011_p9 = pnand %p2547_p8, %p2546_p0 }
 0x146   : > { %p1012_p10 = pneg %p1011_p9 }
 0x148   : > { %1314 = dma.done.wait (%p1012_p10), %s890_s21, 128  }
 0x149   : > { %1316 = vsyncadd (%p1012_p10), %s890_s21, 4294967168  ;;  %s21_s16 = sadd.s32 1, %s1348_s16   ;;  %s2548_s9 = smov %s1324_s10 }
 0x14a   : > { %p18_p11 = scmp.ge.s32.totalorder %s21_s16, 4   ;;  %s2549_s10 = smov %s1328_s11 }
 0x14b   : > { %s2550_s11 = smov %s1429_s24  ;;  %s2551_s12 = smov %s1336_s13 }
 0x14c   : > { %s2323_s13 = smov 0   ;;  %s2552_s14 = smov %s1344_s15 }
 0x14d   : > { %s2553_s15 = smov %s2555_s19  ;;  %20 = sbr.rel (!%p18_p11) target bundleno = 9 (0x9), region = 98 }
 0x152   :  { %895 = vsyncpa [#allocation3], 1 }
 0x153   :  { %897 = vsyncpa [#allocation3 + $0x1], 1 }
 0x154   :  { %898 = vsyncpa [#allocation6], 1 }
 0x155   :  { %900 = vsyncpa [#allocation6 + $0x1], 1 }
 0x156   :  { %901 = vsyncpa [#allocation4], 1 }
 0x157   :  { %903 = vsyncpa [#allocation4 + $0x1], 1 }

</bundles_post_ra>
